<compile_context>
chip_gen: v7x
topology: tpu7x:2x2x1
jax: 0.10.0
libtpu: 0.0.40
codegen_flags: <defaults>
</compile_context>

<pallas_src>
import functools

import jax
import jax.numpy as jnp
import numpy as np
from jax import lax
from jax.experimental import pallas as pl
from jax.experimental.pallas import tpu as pltpu


def _round_up(x, m):
    return (x + m - 1) // m * m


def _res2net_chunk_kernel(x_ref, w_ref, p_ref, o_ref, yprev_ref, *,
                          cc, t, t_pad, k, d, pad):
    """One (batch, chunk) pair per grid step; chunk axis runs sequentially.

    x_ref : (1, 1, Cc, T_pad)      input chunk s+1 of batch b
    w_ref : (1, K, Cc, Cc) bf16    conv weights of TDNN block s, w[kk, o, i]
    p_ref : (1, Cc, 3) f32         [:,0]=conv bias, [:,1]=BN scale, [:,2]=BN shift
    o_ref : (1, 1, Cc, T_pad)      output chunk s+1 of batch b
    yprev_ref : (Cc, T_pad) f32    VMEM scratch carrying y_{i-1} across chunks
    """
    s = pl.program_id(1)

    # First TDNN block of this batch element: there is no previous chunk output.
    @pl.when(s == 0)
    def _():
        yprev_ref[...] = jnp.zeros_like(yprev_ref)

    # Conv input z_i = x_i + y_{i-1}   (y_0 := 0), accumulated in f32.
    z = x_ref[0, 0].astype(jnp.float32) + yprev_ref[...]
    zb = z.astype(jnp.bfloat16)                          # MXU fast-path operand

    # Reflect padding at the *true* sequence boundaries (columns 0 and t-1).
    # Columns [t, t_pad) are lane-alignment filler only; the explicit
    # right-reflect columns below guarantee they never reach a valid output.
    left = [zb[:, j:j + 1] for j in range(pad, 0, -1)]
    right = [zb[:, t - 2 - j:t - 1 - j] for j in range(pad)]
    pieces = left + [zb[:, :t]] + right
    if t_pad > t:
        pieces.append(zb[:, t:])                         # filler, values unused
    zp = jnp.concatenate(pieces, axis=1)                 # (Cc, T_pad + 2*pad)

    # K accumulating (Cc, Cc) @ (Cc, T_pad) matmuls on shifted views of the
    # single padded tile (no fused (K*Cc, T) RHS materialization).
    acc = None
    for kk in range(k):
        rhs = zp[:, kk * d:kk * d + t_pad]
        part = jnp.dot(w_ref[0, kk], rhs, preferred_element_type=jnp.float32)
        acc = part if acc is None else acc + part

    acc = acc + p_ref[0, :, 0:1]                         # conv bias
    acc = jnp.maximum(acc, 0.0)                          # ReLU
    y = acc * p_ref[0, :, 1:2] + p_ref[0, :, 2:3]        # folded eval-mode BN

    yprev_ref[...] = y                                   # carry to next chunk
    o_ref[0, 0, :, :] = y.astype(o_ref.dtype)


def res2net_block(x, w_kio, affine, *, scale, kernel_size, dilation):
    """x: (B, C, T); w_kio: (scale-1, K, Cc, Cc); affine: (scale-1, Cc, 3)."""
    B, C, T = x.shape
    assert scale >= 2 and C % scale == 0
    Cc = C // scale
    K = kernel_size
    assert K % 2 == 1, "symmetric 'same' padding requires odd kernel_size"
    pad = dilation * (K - 1) // 2
    assert T > pad, "reflect padding requires T > pad"
    assert w_kio.shape == (scale - 1, K, Cc, Cc)
    assert affine.shape == (scale - 1, Cc, 3)

    T_pad = _round_up(T, 128)     # lane-dense blocks -> unmasked vector stores
    x_r = x.reshape(B, scale, Cc, T)
    if T_pad != T:
        x_r = jnp.pad(x_r, ((0, 0), (0, 0), (0, 0), (0, T_pad - T)))

    kernel = functools.partial(_res2net_chunk_kernel, cc=Cc, t=T, t_pad=T_pad,
                               k=K, d=dilation, pad=pad)

    out = pl.pallas_call(
        kernel,
        out_shape=jax.ShapeDtypeStruct((B, scale, Cc, T_pad), x.dtype),
        grid=(B, scale - 1),
        in_specs=[
            # Only chunks 1..scale-1 are ever read; chunk 0 stays in HBM.
            pl.BlockSpec((1, 1, Cc, T_pad), lambda b, s: (b, s + 1, 0, 0)),
            # Per-chunk conv weights, selected by the chunk grid index.
            pl.BlockSpec((1, K, Cc, Cc), lambda b, s: (s, 0, 0, 0)),
            pl.BlockSpec((1, Cc, 3), lambda b, s: (s, 0, 0)),
        ],
        out_specs=pl.BlockSpec((1, 1, Cc, T_pad), lambda b, s: (b, s + 1, 0, 0)),
        scratch_shapes=[pltpu.VMEM((Cc, T_pad), jnp.float32)],
        # Chunk 0 is an identity passthrough: alias the (reshaped) input with
        # the output so its channels never move through the kernel at all.
        input_output_aliases={0: 0},
        compiler_params=pltpu.CompilerParams(
            dimension_semantics=("parallel", "arbitrary")),
    )(x_r, w_kio, affine)

    return out[..., :T].reshape(B, C, T)


def prepare_params(w_oik, bias, gamma, beta, mean, var, eps=1e-5):
    """Torch-layout params -> kernel layout (folds eval-mode BN into scale/shift).

    w_oik: (scale-1, Cc, Cc, K)  per-block conv weights (out, in, tap)
    bias/gamma/beta/mean/var: (scale-1, Cc, 1)
    Returns w_kio (scale-1, K, Cc, Cc) bf16 and affine (scale-1, Cc, 3) f32.
    """
    w_kio = jnp.transpose(w_oik, (0, 3, 1, 2)).astype(jnp.bfloat16)
    s = gamma * lax.rsqrt(var + eps)
    shift = beta - mean * s
    affine = jnp.concatenate([bias, s, shift], axis=-1).astype(jnp.float32)
    return w_kio, affine


def res2net_ref(x, w_oik, b, gamma, beta, mean, var, *, scale, dilation, eps=1e-5):
    """Pure-JAX f32 reference (mirrors the PyTorch forward, eval-mode BN)."""
    K = w_oik.shape[-1]
    p = dilation * (K - 1) // 2
    chunks = jnp.split(x, scale, axis=1)
    ys, y_prev = [], None
    for i, xi in enumerate(chunks):
        if i == 0:
            yi = xi
        else:
            inp = xi if i == 1 else xi + y_prev
            xp = jnp.pad(inp, ((0, 0), (0, 0), (p, p)), mode="reflect")
            conv = lax.conv_general_dilated(
                xp, w_oik[i - 1], window_strides=(1,), padding="VALID",
                rhs_dilation=(dilation,),
                dimension_numbers=("NCH", "OIH", "NCH"),
                precision=lax.Precision.HIGHEST)
            conv = conv + b[i - 1][None]
            a = jnp.maximum(conv, 0.0)
            yi = ((a - mean[i - 1][None]) * lax.rsqrt(var[i - 1][None] + eps)
                  * gamma[i - 1][None] + beta[i - 1][None])
        ys.append(yi)
        y_prev = yi
    return jnp.concatenate(ys, axis=1)


if __name__ == "__main__":
    # Small shapes consistent with the module: (B, C, T) = (2, 32, 40),
    # scale=4 -> per-chunk channels 8, kernel_size=3, dilation=2.
    # T=40 deliberately exercises the lane-padding (-> 128) path.
    B, C, T = 2, 32, 40
    scale, K, dilation = 4, 3, 2
    Cc = C // scale

    key = jax.random.PRNGKey(0)
    kx, kw, kb, kg, kbe, km, kv = jax.random.split(key, 7)
    x = jax.random.normal(kx, (B, C, T), jnp.float32)

    fan_in = Cc * K
    bound = 1.0 / float(np.sqrt(fan_in))
    w_oik = jax.random.uniform(kw, (scale - 1, Cc, Cc, K), jnp.float32, -bound, bound)
    bias = jax.random.uniform(kb, (scale - 1, Cc, 1), jnp.float32, -bound, bound)
    gamma = 1.0 + 0.1 * jax.random.normal(kg, (scale - 1, Cc, 1), jnp.float32)
    beta = 0.1 * jax.random.normal(kbe, (scale - 1, Cc, 1), jnp.float32)
    mean = 0.1 * jax.random.normal(km, (scale - 1, Cc, 1), jnp.float32)
    var = 1.0 + 0.1 * jnp.abs(jax.random.normal(kv, (scale - 1, Cc, 1), jnp.float32))

    w_kio, affine = prepare_params(w_oik, bias, gamma, beta, mean, var)

    out = res2net_block(x, w_kio, affine, scale=scale, kernel_size=K,
                        dilation=dilation)
    out = jax.block_until_ready(out)

    ref = res2net_ref(x, w_oik, bias, gamma, beta, mean, var,
                      scale=scale, dilation=dilation)
    # Kernel matmuls use the bf16 MXU fast path (f32 accumulation), so compare
    # against the full-precision f32 reference with bf16-level tolerances.
    err = np.max(np.abs(np.asarray(out) - np.asarray(ref)))
    np.testing.assert_allclose(np.asarray(out), np.asarray(ref),
                               rtol=3e-2, atol=8e-2)
    print("KERNEL_OK")
</pallas_src>

<mosaic_0001>
module attributes {stable_mosaic.version = 11 : i64} {
  func.func @_res2net_chunk_kernel(%arg0: i32, %arg1: i32, %arg2: memref<1x1x8x128xf32, #tpu.memory_space<vmem>>, %arg3: memref<1x3x8x8xbf16, #tpu.memory_space<vmem>>, %arg4: memref<1x8x3xf32, #tpu.memory_space<vmem>>, %arg5: memref<1x1x8x128xf32, #tpu.memory_space<vmem>>, %arg6: memref<8x128xf32, #tpu.memory_space<vmem>>) attributes {dimension_semantics = [#tpu.dimension_semantics<parallel>, #tpu.dimension_semantics<arbitrary>], iteration_bounds = array<i64: 2, 3>, scalar_prefetch = 0 : i64, scratch_operands = 1 : i64, tpu.core_type = #tpu.core_type<tc>, window_params = [{transform_indices = @transform_0, window_bounds = array<i64: 1, 1, 8, 128>}, {transform_indices = @transform_1, window_bounds = array<i64: 1, 3, 8, 8>}, {transform_indices = @transform_2, window_bounds = array<i64: 1, 8, 3>}, {transform_indices = @transform_3, window_bounds = array<i64: 1, 1, 8, 128>}]} {
    %c0_i32 = arith.constant 0 : i32
    %0 = arith.cmpi eq, %arg1, %c0_i32 : i32
    %1 = arith.extui %0 : i1 to i32
    %c0_i32_0 = arith.constant 0 : i32
    %2 = arith.cmpi ne, %1, %c0_i32_0 : i32
    scf.if %2 {
      %cst_34 = arith.constant 0.000000e+00 : f32
      %47 = vector.broadcast %cst_34 : f32 to vector<8x128xf32>
      %c0_35 = arith.constant 0 : index
      %c0_36 = arith.constant 0 : index
      %48 = vector.load %arg6[%c0_35, %c0_36] : memref<8x128xf32, #tpu.memory_space<vmem>>, vector<8x128xf32>
      tpu.vector_store %arg6[%c0_35, %c0_36], %47 {strides = array<i32>} : memref<8x128xf32, #tpu.memory_space<vmem>>, vector<8x128xf32>,
    } else {
    }
    %c0 = arith.constant 0 : index
    %c0_1 = arith.constant 0 : index
    %c0_2 = arith.constant 0 : index
    %c0_3 = arith.constant 0 : index
    %3 = vector.load %arg2[%c0, %c0_1, %c0_2, %c0_3] : memref<1x1x8x128xf32, #tpu.memory_space<vmem>>, vector<1x1x8x128xf32>
    %4 = vector.shape_cast %3 : vector<1x1x8x128xf32> to vector<8x128xf32>
    %c0_4 = arith.constant 0 : index
    %c0_5 = arith.constant 0 : index
    %5 = vector.load %arg6[%c0_4, %c0_5] : memref<8x128xf32, #tpu.memory_space<vmem>>, vector<8x128xf32>
    %6 = arith.addf %4, %5 : vector<8x128xf32>
    %7 = arith.truncf %6 : vector<8x128xf32> to vector<8x128xbf16>
    %8 = vector.extract_strided_slice %7 {offsets = [0, 2], sizes = [8, 1], strides = [1, 1]} : vector<8x128xbf16> to vector<8x1xbf16>
    %9 = vector.extract_strided_slice %7 {offsets = [0, 1], sizes = [8, 1], strides = [1, 1]} : vector<8x128xbf16> to vector<8x1xbf16>
    %10 = vector.extract_strided_slice %7 {offsets = [0, 38], sizes = [8, 1], strides = [1, 1]} : vector<8x128xbf16> to vector<8x1xbf16>
    %11 = vector.extract_strided_slice %7 {offsets = [0, 37], sizes = [8, 1], strides = [1, 1]} : vector<8x128xbf16> to vector<8x1xbf16>
    %12 = vector.extract_strided_slice %7 {offsets = [0, 0], sizes = [8, 40], strides = [1, 1]} : vector<8x128xbf16> to vector<8x40xbf16>
    %13 = vector.extract_strided_slice %7 {offsets = [0, 40], sizes = [8, 88], strides = [1, 1]} : vector<8x128xbf16> to vector<8x88xbf16>
    %14 = tpu.concatenate %8, %9, %12, %10, %11, %13 in 1 : vector<8x1xbf16>, vector<8x1xbf16>, vector<8x40xbf16>, vector<8x1xbf16>, vector<8x1xbf16>, vector<8x88xbf16> -> vector<8x132xbf16>
    %15 = vector.extract_strided_slice %14 {offsets = [0, 0], sizes = [8, 128], strides = [1, 1]} : vector<8x132xbf16> to vector<8x128xbf16>
    %c0_6 = arith.constant 0 : index
    %c0_7 = arith.constant 0 : index
    %c0_8 = arith.constant 0 : index
    %c0_9 = arith.constant 0 : index
    %16 = vector.load %arg3[%c0_6, %c0_7, %c0_8, %c0_9] : memref<1x3x8x8xbf16, #tpu.memory_space<vmem>>, vector<1x1x8x8xbf16>
    %17 = vector.shape_cast %16 : vector<1x1x8x8xbf16> to vector<8x8xbf16>
    %cst = arith.constant dense<0.000000e+00> : vector<8x128xf32>
    %18 = tpu.matmul %17, %15, %cst {dimension_numbers = #tpu.dot_dimension_numbers<[1], [0], [0], [1], [0, 0, 1, 1], [], []>} : vector<8x8xbf16>, vector<8x128xbf16>, vector<8x128xf32> -> vector<8x128xf32>
    %19 = vector.extract_strided_slice %14 {offsets = [0, 2], sizes = [8, 128], strides = [1, 1]} : vector<8x132xbf16> to vector<8x128xbf16>
    %c0_10 = arith.constant 0 : index
    %c1 = arith.constant 1 : index
    %c0_11 = arith.constant 0 : index
    %c0_12 = arith.constant 0 : index
    %20 = vector.load %arg3[%c0_10, %c1, %c0_11, %c0_12] : memref<1x3x8x8xbf16, #tpu.memory_space<vmem>>, vector<1x1x8x8xbf16>
    %21 = vector.shape_cast %20 : vector<1x1x8x8xbf16> to vector<8x8xbf16>
    %cst_13 = arith.constant dense<0.000000e+00> : vector<8x128xf32>
    %22 = tpu.matmul %21, %19, %cst_13 {dimension_numbers = #tpu.dot_dimension_numbers<[1], [0], [0], [1], [0, 0, 1, 1], [], []>} : vector<8x8xbf16>, vector<8x128xbf16>, vector<8x128xf32> -> vector<8x128xf32>
    %23 = arith.addf %18, %22 : vector<8x128xf32>
    %24 = vector.extract_strided_slice %14 {offsets = [0, 4], sizes = [8, 128], strides = [1, 1]} : vector<8x132xbf16> to vector<8x128xbf16>
    %c0_14 = arith.constant 0 : index
    %c2 = arith.constant 2 : index
    %c0_15 = arith.constant 0 : index
    %c0_16 = arith.constant 0 : index
    %25 = vector.load %arg3[%c0_14, %c2, %c0_15, %c0_16] : memref<1x3x8x8xbf16, #tpu.memory_space<vmem>>, vector<1x1x8x8xbf16>
    %26 = vector.shape_cast %25 : vector<1x1x8x8xbf16> to vector<8x8xbf16>
    %cst_17 = arith.constant dense<0.000000e+00> : vector<8x128xf32>
    %27 = tpu.matmul %26, %24, %cst_17 {dimension_numbers = #tpu.dot_dimension_numbers<[1], [0], [0], [1], [0, 0, 1, 1], [], []>} : vector<8x8xbf16>, vector<8x128xbf16>, vector<8x128xf32> -> vector<8x128xf32>
    %28 = arith.addf %23, %27 : vector<8x128xf32>
    %c0_18 = arith.constant 0 : index
    %c0_19 = arith.constant 0 : index
    %c0_20 = arith.constant 0 : index
    %29 = vector.load %arg4[%c0_18, %c0_19, %c0_20] : memref<1x8x3xf32, #tpu.memory_space<vmem>>, vector<1x8x1xf32>
    %30 = vector.shape_cast %29 : vector<1x8x1xf32> to vector<8x1xf32>
    %31 = vector.broadcast %30 : vector<8x1xf32> to vector<8x128xf32>
    %32 = arith.addf %28, %31 : vector<8x128xf32>
    %cst_21 = arith.constant 0.000000e+00 : f32
    %33 = vector.broadcast %cst_21 : f32 to vector<8x128xf32>
    %34 = arith.maximumf %32, %33 : vector<8x128xf32>
    %c0_22 = arith.constant 0 : index
    %c0_23 = arith.constant 0 : index
    %c1_24 = arith.constant 1 : index
    %35 = vector.load %arg4[%c0_22, %c0_23, %c1_24] : memref<1x8x3xf32, #tpu.memory_space<vmem>>, vector<1x8x1xf32>
    %36 = vector.shape_cast %35 : vector<1x8x1xf32> to vector<8x1xf32>
    %37 = vector.broadcast %36 : vector<8x1xf32> to vector<8x128xf32>
    %38 = arith.mulf %34, %37 : vector<8x128xf32>
    %c0_25 = arith.constant 0 : index
    %c0_26 = arith.constant 0 : index
    %c2_27 = arith.constant 2 : index
    %39 = vector.load %arg4[%c0_25, %c0_26, %c2_27] : memref<1x8x3xf32, #tpu.memory_space<vmem>>, vector<1x8x1xf32>
    %40 = vector.shape_cast %39 : vector<1x8x1xf32> to vector<8x1xf32>
    %41 = vector.broadcast %40 : vector<8x1xf32> to vector<8x128xf32>
    %42 = arith.addf %38, %41 : vector<8x128xf32>
    %c0_28 = arith.constant 0 : index
    %c0_29 = arith.constant 0 : index
    %43 = vector.load %arg6[%c0_28, %c0_29] : memref<8x128xf32, #tpu.memory_space<vmem>>, vector<8x128xf32>
    tpu.vector_store %arg6[%c0_28, %c0_29], %42 {strides = array<i32>} : memref<8x128xf32, #tpu.memory_space<vmem>>, vector<8x128xf32>,
    %c0_30 = arith.constant 0 : index
    %c0_31 = arith.constant 0 : index
    %c0_32 = arith.constant 0 : index
    %c0_33 = arith.constant 0 : index
    %44 = vector.load %arg5[%c0_30, %c0_31, %c0_32, %c0_33] : memref<1x1x8x128xf32, #tpu.memory_space<vmem>>, vector<1x1x8x128xf32>
    %45 = vector.shape_cast %44 : vector<1x1x8x128xf32> to vector<8x128xf32>
    %46 = vector.shape_cast %42 : vector<8x128xf32> to vector<1x1x8x128xf32>
    tpu.vector_store %arg5[%c0_30, %c0_31, %c0_32, %c0_33], %46 {strides = array<i32>} : memref<1x1x8x128xf32, #tpu.memory_space<vmem>>, vector<1x1x8x128xf32>,
    return
  }
  func.func @transform_0(%arg0: i32, %arg1: i32) -> (i32, i32, i32, i32) {
    %c1_i32 = arith.constant 1 : i32
    %0 = arith.addi %arg1, %c1_i32 : i32
    %c0_i32 = arith.constant 0 : i32
    %c0_i32_0 = arith.constant 0 : i32
    %c0_i32_1 = arith.constant 0 : i32
    return %arg0, %0, %c0_i32, %c0_i32_0 : i32, i32, i32, i32
  }
  func.func @transform_1(%arg0: i32, %arg1: i32) -> (i32, i32, i32, i32) {
    %c0_i32 = arith.constant 0 : i32
    %c0_i32_0 = arith.constant 0 : i32
    %c0_i32_1 = arith.constant 0 : i32
    %c0_i32_2 = arith.constant 0 : i32
    return %arg1, %c0_i32, %c0_i32_0, %c0_i32_1 : i32, i32, i32, i32
  }
  func.func @transform_2(%arg0: i32, %arg1: i32) -> (i32, i32, i32) {
    %c0_i32 = arith.constant 0 : i32
    %c0_i32_0 = arith.constant 0 : i32
    %c0_i32_1 = arith.constant 0 : i32
    return %arg1, %c0_i32, %c0_i32_0 : i32, i32, i32
  }
  func.func @transform_3(%arg0: i32, %arg1: i32) -> (i32, i32, i32, i32) {
    %c1_i32 = arith.constant 1 : i32
    %0 = arith.addi %arg1, %c1_i32 : i32
    %c0_i32 = arith.constant 0 : i32
    %c0_i32_0 = arith.constant 0 : i32
    %c0_i32_1 = arith.constant 0 : i32
    return %arg0, %0, %c0_i32, %c0_i32_0 : i32, i32, i32, i32
  }
}

</mosaic_0001>

<bundles_post_ra>
// kernel: tpu_custom_call.1
= control target key start
LH: loop header
LB: loop body
LE: loop exit
PB: predicated region body
PF: predicated region fallthrough
CT: control target
= control target key end

     0   :  { %s1127_s0 = inlined_call_operand.hbm [shape: f32[2,4,8,128], index: 0, kind: input, shape index: {}, may-alias: {0,3}]   ;;  %s1128_s1 = inlined_call_operand.vmem [shape: bf16[3,3,8,8], index: 1, kind: input, shape index: {}]   ;;  %s1129_s2 = inlined_call_operand.vmem [shape: f32[3,8,3], index: 2, kind: input, shape index: {}]   ;;  %s1130_s3 = inlined_call_operand.hbm [shape: f32[2,4,8,128], index: 3, kind: output, shape index: {}, may-alias: {0,3}]  }
   0x1   :  { %1132 = sst [smem:[#allocation9_spill]] %s1127_s0 }
   0x2   :  { %8 = vsyncpa [#allocation4], 0 }
   0x3   :  { %10 = vsyncpa [#allocation4 + $0x1], 0 }
   0x4   :  { %11 = vsyncpa [#allocation5], 0 }
   0x5   :  { %13 = vsyncpa [#allocation5 + $0x1], 0  ;;  %s894_s12 = smov 0   ;;  %s896_s13 = smov 0  }
   0x6   :  { %s898_s14 = smov 0   ;;  %s900_s15 = smov 0  }
   0x7   :  { %s902_s16 = smov 0   ;;  %s904_s17 = smov 0  }
   0x8   :  { %s906_s18 = smov 0   ;;  %s908_s19 = smov 0  }
   0x9 LB: > { %s588_s20 = sadd.s32 4294967295, %s859_s19   ;;  %s589_s21 = sadd.s32 4294967294, %s859_s19   ;;  %s859_s19 = sphi %s908_s19, %s19_s19   ;;  %s855_s18 = sphi %s906_s18, %s1149_s18   ;;  %s851_s17 = sphi %s904_s17, %s1148_s17   ;;  %s847_s16 = sphi %s902_s16, %s1147_s16   ;;  %s843_s15 = sphi %s900_s15, %s1146_s15   ;;  %s839_s14 = sphi %s898_s14, %s1145_s14   ;;  %s835_s13 = sphi %s896_s13, %s1144_s13   ;;  %s831_s12 = sphi %s894_s12, %s1143_s12  }
   0xa   : > { %s28_s22 = sadd.s32 1, %s851_s17  ;;  %s31_s23 = sadd.s32 1, %s855_s18 }
   0xb   : > { %p29_p0 = scmp.ge.s32.totalorder %s28_s22, 3  ;;  %s42_s24 = sadd.s32 1, %s839_s14 }
   0xc   : > { %p49_p1 = scmp.ne.s32.totalorder %s839_s14, %s835_s13  ;;  %p50_p2 = scmp.eq.s32.totalorder %s859_s19, 0 }
   0xd   : > { %s942_s25 = scalar_select %p29_p0, 0, %s28_s22  }
   0xe   : > { %s1151_s23 = smov (!%p29_p0, %s31_s23), %s855_s18  ;;  %p949_p3 = por %p50_p2, %p49_p1 }
   0xf   : > { %s36_s26 = sadd.s32 1, %s942_s25  ;;  %p33_p4 = scmp.ge.s32.totalorder %s1151_s23, 2 }
  0x10   : > { %s38_s28 = ssub.s32 %s28_s22, %s36_s26  ;;  %p55_p5 = scmp.ne.s32.totalorder %s835_s13, %s831_s12 }
  0x11   : > { %p56_p6 = scmp.eq.s32.totalorder %s588_s20, 0  ;;  %s1153_s23 = smov (%p33_p4, %s1151_s23), 0 }
  0x12   : > { %p135_p8 = scmp.eq.s32.totalorder %s588_s20, 5  ;;  %s37_s30 = ssub.s32 %s855_s18, %s1153_s23 }
  0x13   : > { %p957_p7 = por %p56_p6, %p55_p5  ;;  %p141_p9 = scmp.eq.s32.totalorder %s589_s21, 5 }
  0x14   : > { %s39_s4 = sor.u32 %s38_s28, %s37_s30  ;;  %p966_p10 = por %p135_p8, %p49_p1 }
  0x15   : > { %p40_p11 = scmp.eq.s32.totalorder %s39_s4, 0  ;;  %p970_p12 = por %p141_p9, %p55_p5 }
  0x16   : > { %s1135_s5 = scalar_select %p966_p10, 1, 0 }
  0x17   : > { %s1136_s6 = scalar_select %p970_p12, 1, 0 }
  0x18   : > { %p648_p13 = scmp.lt.s32.totalorder %s859_s19, 6  ;;  %s161_s8 = sand.u32 1, %s839_s14  }
  0x19   : > { %s976_s7 = scalar_select %p40_p11, %s839_s14, %s42_s24  }
  0x1a   : > { %s593_s9 = sshll.u32 %s855_s18, 2  ;;  %s592_s10 = sshll.u32 %s161_s8, 3 }
  0x1b   : > { %s505_s11 = sadd.s32 %s851_s17, %s593_s9  ;;  %s165_s21 = scalar_lea.vmem [#allocation3], %s592_s10 }
  0x1c   : > { %s594_s20 = sshll.u32 %s505_s11, 7  ;;  %s175_s22 = sshll.u32 %s165_s21, 4  ;;  %s984_s22 = int_to_ptr.vmem [resolvable:$true] %s175_s22 }
  0x1d   : > { %s1137_s0 = sld [smem:[#allocation9_spill]]  ;;  %p990_p0 = pnand %p648_p13, %p949_p3 }
  0x1e   : > { %s162_s9 = scalar_lea.sflag [#allocation4], %s161_s8 }
  0x1f   : > { %p731_p5 = pneg %p990_p0 }
  0x23   : > { %s507_s30 = scalar_lea.hbm %s1137_s0, %s594_s20  ;;  %s734_s20 = scalar_lea.hbm %s1137_s0, 1024 }
  0x24   : > { %s986_s4 = scalar_lea.hbm %s507_s30, 128  ;;  %s759_s10 = scalar_lea.hbm %s507_s30, 256 }
  0x25   : > { %p730_p4 = scmp.ne.s32.totalorder %s986_s4, %s759_s10  ;;  %p735_p3 = scmp.lt.u32.totalorder %s986_s4, %s1137_s0 }
  0x26   : > { %p736_p9 = scmp.lt.u32.totalorder %s734_s20, %s759_s10  ;;  %p738_p13 = scmp.lt.u32.totalorder %s759_s10, %s986_s4 }
  0x27   : > { %p732_p6 = pnand %p731_p5, %p730_p4 }
  0x28   : > { %p737_p11 = por %p736_p9, %p735_p3 }
  0x29   : > { %p733_p8 = pneg %p732_p6 }
  0x2a   : > { %p739_p1 = por %p738_p13, %p737_p11 }
  0x2c   : > { %p740_p2 = pnand %p739_p1, %p733_p8 }
  0x2e   : > { %743 = shalt.err (!%p740_p2)
}
  0x2f   : > { %s744_s8 = scalar_lea.vmem %s984_s22, 128  ;;  %s861_s28 = smov [#allocation3]  }
  0x30   : > { %p745_p4 = scmp.ne.s32.totalorder %s984_s22, %s744_s8  ;;  %s749_s30 = sshll.u32 %s861_s28, 4  ;;  %s750_s30 = int_to_ptr.vmem [resolvable:$false] %s749_s30 }
  0x31   : > { %s751_s27 = scalar_lea.vmem %s750_s30, 256  ;;  %p752_p10 = scmp.lt.s32.totalorder %s984_s22, %s750_s30 }
  0x32   : > { %p747_p6 = pnand %p745_p4, %p731_p5  ;;  %p753_p3 = scmp.lt.s32.totalorder %s751_s27, %s744_s8 }
  0x34   : > { %p748_p12 = pneg %p747_p6  ;;  %p754_p9 = por %p753_p3, %p752_p10 }
  0x36   : > { %p755_p11 = pnand %p754_p9, %p748_p12 }
  0x38   : > { %758 = shalt.err (!%p755_p11)
}
  0x39   : > { %643 = dma.hbm_to_vmem [thread:$0]  (!%p990_p0), %s986_s4, 128, %s984_s22, %s162_s9  }
  0x3a   : > { %p1139_p1 = scmp.lt.s32.totalorder %s859_s19, 7  ;;  %p1140_p2 = scmp.ge.s32.totalorder %s859_s19, 1 }
  0x3c   : > { %p196_p5 = pnand %p1140_p2, %p1139_p1 }
  0x3d   : > { %s1025_s10 = sand.u32 (!%p196_p5), 1, %s835_s13  }
  0x3e   : > { %199 = sbr.rel (%p196_p5) target bundleno = 573 (0x23d), region = 32  ;;  %s596_s11 = sshll.u32 (!%p196_p5), %s1025_s10, 3 }
  0x3f   : > { %s202_s20 = scalar_lea.sflag (!%p196_p5), [#allocation4], %s1025_s10  ;;  %s205_s21 = scalar_lea.vmem (!%p196_p5), [#allocation3], %s596_s11 }
  0x45   : > { %822 = dma.done.wait (%p957_p7), %s202_s20, 128  }
  0x46   : > { %824 = vsyncadd (%p957_p7), %s202_s20, 4294967168  ;;  %p238_p10 = scmp.lt.s32.totalorder %s843_s15, 2  ;;  %s1045_s0 = scalar_lea.vmem [#allocation6], %s596_s11 }
  0x47   : > { %p600_p7 = scmp.ne.s32.totalorder %s843_s15, 0 }
  0x48   : > { %s239_s22 = scalar_select %p238_p10, %s843_s15, 2 }
  0x49   : > { %252 = sbr.rel (%p600_p7) target bundleno = 80 (0x50), region = 40  ;;  %v862_v0 = vmov (!%p600_p7), 0.0  }
  0x4a   : > { %s635_s4 = smul.u32 12, %s239_s22  ;;  %s599_s24 = sshll.u32 %s239_s22, 3  ;;  %253 = vst [vmem:[#allocation2] sm:$0xff] (!%p600_p7), %v862_v0 }
  0x4b   : > { %s1038_s8 = scalar_lea.vmem %s1129_s2, %s599_s24 }
  0x4c   : > { %s1043_s27 = scalar_lea.vmem %s1128_s1, %s635_s4 }
  0x50 PF: > { %v254_v1 = vld [vmem:[%s205_s21] sm:$0xff]  ;;  %v863_v4 = vmov 0.0   ;;  %s864_s29 = smov 4   ;;  %s865_s20 = smov 126   ;;  %vm868_vm0 = vmmov 0   ;;  %vm267_vm1 = vcmask 7168  }
  0x51   : > { %v255_v2 = vld [vmem:[#allocation2] sm:$0xff]  ;;  %623 = vmatprep.subr.bf16.mxu1 %v863_v4  ;;  %617 = vmatprep.subr.bf16.mxu0 %v863_v4  ;;  %s866_s11 = smov 2   ;;  %s867_s22 = smov 6   ;;  %vm271_vm2 = vcmask 15360   ;;  %vm274_vm3 = vcmask 343040   ;;  %vm277_vm4 = vcmask 351232  }
  0x52   : > { %v256_v3 = vadd.f32 %v255_v2, %v254_v1  ;;  %619 = vmatprep.mubr.msk.bf16.mxu0 %vm868_vm0, %v863_v4  ;;  %625 = vmatprep.mubr.msk.bf16.mxu1 %vm868_vm0, %v863_v4  ;;  %s869_s21 = smov 124   ;;  %vm280_vm5 = vcmask 359424   ;;  %vm296_vm6 = vcmask 1043456   ;;  %v440_v16 = vld [vmem:[%s1038_s8] sm:$0xff]  ;;  %vm292_vm7 = vcmask 64512   ;;  %s607_s4 = sshll.u32 %s847_s16, 2 }
  0x53   : > { %v282_v17 = vld [vmem:[%s1043_s27] sm:$0xf]  ;;  %v870_v18 = vmov 0   ;;  %v871_v19 = vmov 1   ;;  %v872_v20 = vmov 2   ;;  %vm290_vm8 = vcmask 1031168   ;;  %s534_s24 = sadd.s32 %s843_s15, %s607_s4 }
  0x54   : > { %v257_v5 = vpack.c.bf16 %v256_v3, %v256_v3  ;;  %725 = vset.pattern.permute.xlu0 %v870_v18  ;;  %726 = vset.pattern.permute.xlu1 %v871_v19  ;;  %vm391_vm9 = vcmask 1014784   ;;  %v601_v25 = vld [vmem:[%s1043_s27 + $0x4] sm:$0xf]  ;;  %v604_v30 = vld [vmem:[%s1043_s27 + $0x8] sm:$0xf]  ;;  %s608_s9 = sshll.u32 %s534_s24, 7 }
  0x55   : > { %s536_s28 = scalar_lea.hbm %s1130_s3, %s608_s9  ;;  %s477_s16 = sshll.u32 %s1045_s0, 4  ;;  %s1075_s16 = int_to_ptr.vmem [resolvable:$true] %s477_s16 }
  0x56   : > { %263 = vrot.lane.b32.xlu1 %v257_v5, %s864_s29  ;;  %259 = vrot.lane.b32.xlu0 %v257_v5, %s865_s20  ;;  %s1073_s30 = scalar_lea.hbm %s536_s28, 128  ;;  %s461_s15 = scalar_lea.sflag [#allocation5], %s1025_s10 }
  0x57   : > { %s760_s27 = scalar_lea.vmem %s1075_s16, 128  ;;  %p1141_p0 = scmp.ne.s32.totalorder %s1135_s5, 0 }
  0x58   : > { %p761_p12 = scmp.ne.s32.totalorder %s1075_s16, %s760_s27  ;;  %s873_s29 = smov [#allocation6]  }
  0x5a   : > { %261 = vrot.lane.b32.xlu0 %v257_v5, %s866_s11  ;;  %265 = vrot.lane.b32.xlu1 %v257_v5, %s867_s22  ;;  %p762_p8 = pnand %p761_p12, %p1141_p0 }
  0x5c   : > { %p763_p13 = pneg %p762_p8 }
  0xc8   : > { %v264_v6 = vpop.permute.xlu1 %263  ;;  %v260_v7 = vpop.permute.xlu0 %259 }
  0xc9   : > { %288 = vrot.lane.b32.xlu1 %v264_v6, %s865_s20  ;;  %v270_v8 = vsel %vm267_vm1, %v260_v7, %v257_v5 }
  0xcc   : > { %v262_v9 = vpop.permute.xlu0 %261  ;;  %v266_v10 = vpop.permute.xlu1 %265 }
  0xcd   : > { %v273_v11 = vsel %vm271_vm2, %v270_v8, %v262_v9  ;;  %389 = vrot.lane.b32.xlu1 %v264_v6, %s869_s21 }
  0xce   : > { %v276_v12 = vsel %vm274_vm3, %v273_v11, %v264_v6 }
  0xcf   : > { %v279_v13 = vsel %vm277_vm4, %v276_v12, %v266_v10 }
  0xd0   : > { %v281_v14 = vsel %vm280_vm5, %v279_v13, %v264_v6 }
  0xd1   : > { %286 = vrot.lane.b32.xlu0 %v281_v14, %s865_s20  ;;  %v343_v15 = vsel %vm296_vm6, %v281_v14, 0  ;;  %449 = vperm.xlu1 %726, %v440_v16   ;;  %s764_s20 = sshll.u32 %s873_s29, 4  ;;  %s765_s20 = int_to_ptr.vmem [resolvable:$false] %s764_s20 }
  0xd2   : > { %624 = vmatpush3.bf16.msra.mxu1 %v343_v15  ;;  %s766_s11 = scalar_lea.vmem %s765_s20, 256  ;;  %p767_p4 = scmp.lt.s32.totalorder %s1075_s16, %s765_s20 }
  0xd3   : > { %p768_p6 = scmp.lt.s32.totalorder %s766_s11, %s760_s27 }
  0xd5   : > { %387 = vrot.lane.b32.xlu0 %v281_v14, %s869_s21  ;;  %626 = vmatmul.mubr.msk.bf16.vlgmr.msra.gmra.mrb[0].mxu1 %vm292_vm7, %v282_v17  ;;  %p769_p3 = por %p768_p6, %p767_p4 }
  0xd6   : > { %727 = vset.pattern.permute.xlu1 %v872_v20 }
  0xd7   : > { %454 = vperm.xlu1 %727, %v440_v16   ;;  %p770_p9 = pnand %p769_p3, %p763_p13 }
  0xd9   : > { %443 = vperm.xlu0 %725, %v440_v16  }
  0xdd   : > { %728 = vset.pattern.permute.xlu0 %v872_v20 }
 0x13b   : > { %v289_v21 = vpop.permute.xlu1 %288 }
 0x13f   : > { %v390_v26 = vpop.permute.xlu1 %389 }
 0x143   : > { %v287_v22 = vpop.permute.xlu0 %286 }
 0x144   : > { %v291_v23 = vsel %vm290_vm8, %v287_v22, %v289_v21 }
 0x145   : > { %v298_v24 = vsel %vm296_vm6, %v291_v23, 0 }
 0x146   : > { %618 = vmatpush3.bf16.msra.mxu0 %v298_v24 }
 0x147   : > { %v388_v27 = vpop.permute.xlu0 %387  ;;  %629 = vmatprep.subr.bf16.mxu0 %v863_v4 }
 0x148   : > { %v392_v28 = vsel %vm391_vm9, %v388_v27, %v390_v26 }
 0x149   : > { %v397_v29 = vsel %vm296_vm6, %v392_v28, 0  ;;  %620 = vmatmul.mubr.msk.bf16.vlgmr.msra.gmra.mrb[0].mxu0 %vm292_vm7, %v601_v25 }
 0x14a   : > { %630 = vmatpush3.bf16.msra.mxu0 %v397_v29  ;;  %631 = vmatprep.mubr.msk.bf16.mxu0 %vm868_vm0, %v863_v4 }
 0x150   : > { %v450_v42 = vpop.permute.xlu1 %449 }
 0x151   : > { %632 = vmatmul.mubr.msk.bf16.vlgmr.msra.gmra.mrb[4].mxu0 %vm292_vm7, %v604_v30 }
 0x156   : > { %v455_v49 = vpop.permute.xlu1 %454 }
 0x158   : > { %v444_v40 = vpop.permute.xlu0 %443 }
 0x1a8   : > { %v379_v31 = vpop.f32.mrb[0].mxu1 }
 0x1a9   : > { %v627_v32 = vpop.f32.mrb[1].mxu1 }
 0x1aa   : > { %v382_v33 = vpop.f32.mrb[2].mxu1 }
 0x1ab   : > { %v628_v34 = vpop.f32.mrb[3].mxu1 }
 0x21c   : > { %v334_v35 = vpop.f32.mrb[0].mxu0 }
 0x21d   : > { %v621_v36 = vpop.f32.mrb[1].mxu0  ;;  %v380_v37 = vadd.f32 %v379_v31, %v334_v35 }
 0x21e   : > { %v337_v38 = vpop.f32.mrb[2].mxu0 }
 0x21f   : > { %v622_v39 = vpop.f32.mrb[3].mxu0 }
 0x224   : > { %v433_v41 = vpop.f32.mrb[4].mxu0 }
 0x225   : > { %v439_v43 = vadd.f32 %v433_v41, %v380_v37  ;;  %v633_v44 = vpop.f32.mrb[5].mxu0 }
 0x226   : > { %v436_v45 = vpop.f32.mrb[6].mxu0 }
 0x227   : > { %v446_v46 = vadd.f32 %v444_v40, %v439_v43  ;;  %v634_v47 = vpop.f32.mrb[7].mxu0 }
 0x229   : > { %v447_v48 = vmax.f32 %v446_v46, 0.0 }
 0x22b   : > { %v452_v50 = vmul.f32 %v450_v42, %v447_v48 }
 0x22d   : > { %v457_v51 = vadd.f32 %v455_v49, %v452_v50 }
 0x22f   : > { %458 = vst [vmem:[#allocation2] sm:$0xff] %v457_v51  ;;  %459 = vst [vmem:[%s1045_s0] sm:$0xff] %v457_v51 }
 0x230   : > { %773 = shalt.err (!%p770_p9)
}
 0x231   : > { %s788_s22 = scalar_lea.hbm %s536_s28, 256  ;;  %s778_s21 = scalar_lea.hbm %s1130_s3, 1024 }
 0x232   : > { %p775_p11 = scmp.ne.s32.totalorder %s1073_s30, %s788_s22  ;;  %p779_p5 = scmp.lt.u32.totalorder %s1073_s30, %s1130_s3 }
 0x233   : > { %p780_p10 = scmp.lt.u32.totalorder %s778_s21, %s788_s22  ;;  %p782_p12 = scmp.lt.u32.totalorder %s788_s22, %s1073_s30 }
 0x234   : > { %p776_p1 = pnand %p775_p11, %p1141_p0 }
 0x235   : > { %p781_p7 = por %p780_p10, %p779_p5 }
 0x236   : > { %p777_p2 = pneg %p776_p1 }
 0x237   : > { %p783_p8 = por %p782_p12, %p781_p7 }
 0x239   : > { %p784_p13 = pnand %p783_p8, %p777_p2 }
 0x23b   : > { %787 = shalt.err (!%p784_p13)
}
 0x23c   : > { %638 = dma.vmem_to_hbm [thread:$0]  (%p1141_p0), %s1075_s16, 128, %s1073_s30, %s461_s15  }
 0x23d PF: > { %p649_p4 = scmp.ge.s32.totalorder %s859_s19, 2  ;;  %s489_s9 = sand.u32 1, %s831_s12  }
 0x23e   : > { %p1142_p6 = scmp.ne.s32.totalorder %s1136_s6, 0  ;;  %s490_s26 = scalar_lea.sflag [#allocation5], %s489_s9 }
 0x240   : > { %p645_p3 = pnand %p649_p4, %p1142_p6 }
 0x242   : > { %826 = dma.done.wait (!%p645_p3), %s490_s26, 128  }
 0x243   : > { %828 = vsyncadd (!%p645_p3), %s490_s26, 4294967168  ;;  %s19_s19 = sadd.s32 1, %s859_s19   ;;  %s1143_s12 = smov %s835_s13 }
 0x244   : > { %p16_p9 = scmp.ge.s32.totalorder %s19_s19, 8   ;;  %s1144_s13 = smov %s839_s14 }
 0x245   : > { %s1145_s14 = smov %s976_s7  ;;  %s1146_s15 = smov %s851_s17 }
 0x246   : > { %s1147_s16 = smov %s855_s18  ;;  %s1148_s17 = smov %s942_s25 }
 0x247   : > { %s1149_s18 = smov %s1153_s23  ;;  %18 = sbr.rel (!%p16_p9) target bundleno = 9 (0x9), region = 89 }
 0x24e   :  { %495 = vsyncpa [#allocation4], 1 }
 0x24f   :  { %497 = vsyncpa [#allocation4 + $0x1], 1 }
 0x250   :  { %498 = vsyncpa [#allocation5], 1 }
 0x251   :  { %500 = vsyncpa [#allocation5 + $0x1], 1 }

</bundles_post_ra>
